<compile_context>
chip_gen: v7x
topology: tpu7x:2x2x1
jax: 0.10.0
libtpu: 0.0.40
codegen_flags: <defaults>
</compile_context>

<pallas_src>
import jax
import jax.numpy as jnp
from jax.experimental import pallas as pl
from jax.experimental.pallas import tpu as pltpu

# ----------------------------- configuration -----------------------------
GROUP = 4            # HGConv hardcodes 4 group convs
IN_CHANNELS = 32     # inChannels
GC = IN_CHANNELS // GROUP
B, H, W = 2, 16, 16
LANE = 128           # pixel (lane) axis must be padded to a multiple of this


# ------------------------------- kernel ----------------------------------
def hgconv_kernel(x_ref, w_ref, b_ref, o_ref):
    """One batch image, channel-major.

    x_ref : (1, C, P)  input pixels, channels on sublanes, pixels on lanes
    w_ref : (C, C)     fused effective weight, (out_ch, in_ch)
    b_ref : (C, 1)     fused effective bias
    o_ref : (1, C, P)  output pixels
    """
    o_ref[0] = jnp.dot(w_ref[...], x_ref[0],
                       preferred_element_type=jnp.float32) + b_ref[...]


def hgconv_pallas(x_cm, w_cm, b_cm):
    """x_cm: (B, C, P) f32, w_cm: (C, C) (out,in), b_cm: (C, 1)."""
    Bn, C, P = x_cm.shape
    assert C == GROUP * GC and P % LANE == 0
    return pl.pallas_call(
        hgconv_kernel,
        out_shape=jax.ShapeDtypeStruct((Bn, C, P), x_cm.dtype),
        grid_spec=pltpu.PrefetchScalarGridSpec(
            num_scalar_prefetch=0,
            grid=(Bn,),
            in_specs=[
                pl.BlockSpec((1, C, P), lambda b: (b, 0, 0)),
                pl.BlockSpec((C, C), lambda b: (0, 0)),
                pl.BlockSpec((C, 1), lambda b: (0, 0)),
            ],
            out_specs=pl.BlockSpec((1, C, P), lambda b: (b, 0, 0)),
        ),
        compiler_params=pltpu.CompilerParams(
            dimension_semantics=("parallel",)),
    )(x_cm, w_cm, b_cm)


# --------------------------- parameter setup ------------------------------
def make_params(key):
    """Deterministic weight_norm-parameterized 1x1 conv params.

    PyTorch weight_norm (dim=0): w = g * v / ||v||, norm over (in, kH, kW)
    per output channel.  kernel_size=1, so v has shape (GC, GC).
    Returns per-group weights transposed to (in, out) so y = x @ w[g] + b[g].
    """
    ws, bs = [], []
    for gi in range(GROUP):
        kv, kg, kb, key = jax.random.split(jax.random.fold_in(key, gi), 4)
        v = jax.random.normal(kv, (GC, GC), dtype=jnp.float32) * 0.1   # (out, in)
        g = jax.random.uniform(kg, (GC,), dtype=jnp.float32,
                               minval=0.5, maxval=1.5)                 # (out,)
        b = jax.random.normal(kb, (GC,), dtype=jnp.float32) * 0.05
        norm = jnp.sqrt(jnp.sum(v * v, axis=1, keepdims=True))         # (out, 1)
        w_eff = g[:, None] * v / norm                                  # (out, in)
        ws.append(w_eff.T)   # (in, out)
        bs.append(b)
    return jnp.stack(ws, axis=0), jnp.stack(bs, axis=0)


def fuse_params(w_stacked, b_stacked):
    """Precompose the hierarchical chain into one (C, C) weight + (C,) bias.

    With per-group (in, out) weights w[k] and biases b[k]:
        g0 = x0 @ w0 + b0
        gk = (g_{k-1} + xk) @ wk + bk
    =>  gk = sum_{i<=k} xi @ M[i,k] + beta[k]
        M[k,k] = wk;  M[i,k] = M[i,k-1] @ wk;  beta[k] = beta[k-1] @ wk + bk
    Full op:  y = x @ W_total + b_total  (W_total block-upper-triangular in
    (in-group, out-group)).  Done in plain JAX outside the kernel.
    """
    blocks = [[None] * GROUP for _ in range(GROUP)]   # blocks[in_group][out_group]
    betas = []
    beta = None
    for k in range(GROUP):
        wk = w_stacked[k]                             # (GC, GC) (in, out)
        bk = b_stacked[k]
        for i in range(k):
            blocks[i][k] = blocks[i][k - 1] @ wk
        blocks[k][k] = wk
        beta = bk if beta is None else beta @ wk + bk
        betas.append(beta)

    zero = jnp.zeros((GC, GC), dtype=jnp.float32)
    rows = []
    for i in range(GROUP):
        rows.append(jnp.concatenate(
            [blocks[i][k] if k >= i else zero for k in range(GROUP)], axis=1))
    w_total = jnp.concatenate(rows, axis=0)           # (C, C), (in, out)
    b_total = jnp.concatenate(betas, axis=0)          # (C,)
    return w_total, b_total


# ------------------------------ reference ---------------------------------
def hgconv_reference(x_nchw, w_stacked, b_stacked):
    """Pure-JAX reference mirroring the PyTorch forward exactly (NCHW)."""
    gs = [x_nchw[:, i * GC:(i + 1) * GC] for i in range(GROUP)]

    def conv1x1(t, w_t, b):  # t: (B, GC, H, W); w_t: (in, out)
        y = jnp.einsum('bihw,io->bohw', t, w_t)
        return y + b[None, :, None, None]

    g1 = conv1x1(gs[0], w_stacked[0], b_stacked[0])
    g2 = conv1x1(g1 + gs[1], w_stacked[1], b_stacked[1])
    g3 = conv1x1(g2 + gs[2], w_stacked[2], b_stacked[2])
    g4 = conv1x1(g3 + gs[3], w_stacked[3], b_stacked[3])
    return jnp.concatenate([g1, g2, g3, g4], axis=1)


# -------------------------------- wrapper ----------------------------------
def hgconv_forward(x_nchw, w_stacked, b_stacked):
    Bn, C, Hh, Ww = x_nchw.shape
    w_total, b_total = fuse_params(w_stacked, b_stacked)
    w_cm = w_total.T                                  # (out, in) for y = W @ x
    b_cm = b_total[:, None]                           # (C, 1)

    # NCHW is already channel-major; just flatten the spatial dims to lanes.
    HW = Hh * Ww
    x_cm = x_nchw.reshape(Bn, C, HW)
    pad = (-HW) % LANE
    if pad:
        x_cm = jnp.pad(x_cm, ((0, 0), (0, 0), (0, pad)))

    y_cm = hgconv_pallas(x_cm, w_cm, b_cm)
    if pad:
        y_cm = y_cm[:, :, :HW]
    return y_cm.reshape(Bn, C, Hh, Ww)


if __name__ == "__main__":
    key = jax.random.PRNGKey(0)
    kx, kp = jax.random.split(key)
    x = jax.random.normal(kx, (B, IN_CHANNELS, H, W), dtype=jnp.float32)
    w_stacked, b_stacked = make_params(kp)

    out = hgconv_forward(x, w_stacked, b_stacked)
    out = jax.block_until_ready(out)

    ref = hgconv_reference(x, w_stacked, b_stacked)
    assert out.shape == (B, IN_CHANNELS, H, W)
    # Weight fusion reassociates the arithmetic -> tiny (~1e-6) f32 deltas.
    assert jnp.allclose(out, ref, atol=1e-4, rtol=1e-5), \
        f"max abs err {jnp.max(jnp.abs(out - ref))}"

    print("KERNEL_OK")
</pallas_src>

<mosaic_0001>
module attributes {stable_mosaic.version = 11 : i64} {
  func.func @hgconv_kernel(%arg0: i32, %arg1: memref<1x32x256xf32, #tpu.memory_space<vmem>>, %arg2: memref<32x32xf32, #tpu.memory_space<vmem>>, %arg3: memref<32x1xf32, #tpu.memory_space<vmem>>, %arg4: memref<1x32x256xf32, #tpu.memory_space<vmem>>) attributes {dimension_semantics = [#tpu.dimension_semantics<parallel>], iteration_bounds = array<i64: 2>, scalar_prefetch = 0 : i64, scratch_operands = 0 : i64, tpu.core_type = #tpu.core_type<tc>, window_params = [{transform_indices = @transform_0, window_bounds = array<i64: 1, 32, 256>}, {pipeline_mode = #tpu.pipeline_mode<synchronous>, transform_indices = @transform_1, window_bounds = array<i64: 32, 32>}, {pipeline_mode = #tpu.pipeline_mode<synchronous>, transform_indices = @transform_2, window_bounds = array<i64: 32, 1>}, {transform_indices = @transform_3, window_bounds = array<i64: 1, 32, 256>}]} {
    %c0 = arith.constant 0 : index
    %c0_0 = arith.constant 0 : index
    %0 = vector.load %arg2[%c0, %c0_0] : memref<32x32xf32, #tpu.memory_space<vmem>>, vector<32x32xf32>
    %c0_1 = arith.constant 0 : index
    %c0_2 = arith.constant 0 : index
    %c0_3 = arith.constant 0 : index
    %1 = vector.load %arg1[%c0_1, %c0_2, %c0_3] : memref<1x32x256xf32, #tpu.memory_space<vmem>>, vector<1x32x256xf32>
    %2 = vector.shape_cast %1 : vector<1x32x256xf32> to vector<32x256xf32>
    %cst = arith.constant dense<0.000000e+00> : vector<32x256xf32>
    %3 = tpu.matmul %0, %2, %cst {dimension_numbers = #tpu.dot_dimension_numbers<[1], [0], [0], [1], [0, 0, 1, 1], [], []>} : vector<32x32xf32>, vector<32x256xf32>, vector<32x256xf32> -> vector<32x256xf32>
    %c0_4 = arith.constant 0 : index
    %c0_5 = arith.constant 0 : index
    %4 = vector.load %arg3[%c0_4, %c0_5] : memref<32x1xf32, #tpu.memory_space<vmem>>, vector<32x1xf32>
    %5 = vector.broadcast %4 : vector<32x1xf32> to vector<32x256xf32>
    %6 = arith.addf %3, %5 : vector<32x256xf32>
    %c0_6 = arith.constant 0 : index
    %c0_7 = arith.constant 0 : index
    %c0_8 = arith.constant 0 : index
    %7 = vector.load %arg4[%c0_6, %c0_7, %c0_8] : memref<1x32x256xf32, #tpu.memory_space<vmem>>, vector<1x32x256xf32>
    %8 = vector.shape_cast %7 : vector<1x32x256xf32> to vector<32x256xf32>
    %9 = vector.shape_cast %6 : vector<32x256xf32> to vector<1x32x256xf32>
    tpu.vector_store %arg4[%c0_6, %c0_7, %c0_8], %9 {strides = array<i32>} : memref<1x32x256xf32, #tpu.memory_space<vmem>>, vector<1x32x256xf32>,
    return
  }
  func.func @transform_0(%arg0: i32) -> (i32, i32, i32) {
    %c0_i32 = arith.constant 0 : i32
    %c0_i32_0 = arith.constant 0 : i32
    %c0_i32_1 = arith.constant 0 : i32
    return %arg0, %c0_i32, %c0_i32_0 : i32, i32, i32
  }
  func.func @transform_1(%arg0: i32) -> (i32, i32) {
    %c0_i32 = arith.constant 0 : i32
    %c0_i32_0 = arith.constant 0 : i32
    %c0_i32_1 = arith.constant 0 : i32
    return %c0_i32, %c0_i32_0 : i32, i32
  }
  func.func @transform_2(%arg0: i32) -> (i32, i32) {
    %c0_i32 = arith.constant 0 : i32
    %c0_i32_0 = arith.constant 0 : i32
    %c0_i32_1 = arith.constant 0 : i32
    return %c0_i32, %c0_i32_0 : i32, i32
  }
  func.func @transform_3(%arg0: i32) -> (i32, i32, i32) {
    %c0_i32 = arith.constant 0 : i32
    %c0_i32_0 = arith.constant 0 : i32
    %c0_i32_1 = arith.constant 0 : i32
    return %arg0, %c0_i32, %c0_i32_0 : i32, i32, i32
  }
}

</mosaic_0001>

<bundles_post_ra>
// kernel: tpu_custom_call.1
= control target key start
LH: loop header
LB: loop body
LE: loop exit
PB: predicated region body
PF: predicated region fallthrough
CT: control target
= control target key end

     0   :  { %8 = vsyncpa [#allocation3], 0  ;;  %s824_s0 = inlined_call_operand.hbm [shape: f32[2,32,256], index: 0, kind: input, shape index: {}]   ;;  %s825_s1 = inlined_call_operand.vmem [shape: f32[32,32], index: 1, kind: input, shape index: {}]   ;;  %s826_s2 = inlined_call_operand.vmem [shape: f32[32,1], index: 2, kind: input, shape index: {}]   ;;  %s827_s3 = inlined_call_operand.hbm [shape: f32[2,32,256], index: 3, kind: output, shape index: {}]  }
   0x1   :  { %10 = vsyncpa [#allocation3 + $0x1], 0 }
   0x2   :  { %11 = vsyncpa [#allocation4], 0 }
   0x3   :  { %13 = vsyncpa [#allocation4 + $0x1], 0  ;;  %s634_s12 = smov 0   ;;  %s636_s13 = smov 0  }
   0x4   :  { %s638_s14 = smov 0   ;;  %s640_s15 = smov 0  }
   0x5 LB: > { %s655_s16 = sadd.s32 4294967295, %s604_s15   ;;  %s422_s17 = sadd.s32 4294967294, %s604_s15   ;;  %s604_s15 = sphi %s640_s15, %s840_s15   ;;  %s600_s14 = sphi %s638_s14, %s839_s14   ;;  %s596_s13 = sphi %s636_s13, %s838_s13   ;;  %s592_s12 = sphi %s634_s12, %s837_s12  }
   0x6   : > { %s659_s18 = sadd.s32 1, %s604_s15   ;;  %s26_s19 = sadd.s32 1, %s600_s14 }
   0x7   : > { %s23_s20 = ssub.s32 %s604_s15, %s659_s18  ;;  %p33_p0 = scmp.ne.s32.totalorder %s600_s14, %s596_s13 }
   0x8   : > { %p24_p1 = scmp.eq.s32.totalorder %s23_s20, 0  ;;  %p34_p2 = scmp.eq.s32.totalorder %s604_s15, 0 }
   0x9   : > { %p39_p3 = scmp.ne.s32.totalorder %s596_s13, %s592_s12  ;;  %p40_p4 = scmp.eq.s32.totalorder %s655_s16, 0 }
   0xa   : > { %s671_s21 = scalar_select %p24_p1, %s600_s14, %s26_s19  }
   0xb   : > { %p673_p5 = por %p34_p2, %p33_p0  ;;  %p677_p6 = por %p40_p4, %p39_p3 }
   0xc   : > { %p105_p7 = scmp.eq.s32.totalorder %s655_s16, 1  ;;  %p111_p8 = scmp.eq.s32.totalorder %s422_s17, 1 }
   0xd   : > { %p466_p10 = scmp.lt.s32.totalorder %s604_s15, 2  ;;  %s137_s26 = sand.u32 1, %s600_s14  }
   0xe   : > { %p684_p11 = por %p105_p7, %p33_p0  ;;  %p688_p12 = por %p111_p8, %p39_p3 }
   0xf   : > { %s440_s27 = sshll.u32 %s604_s15, 10  ;;  %s425_s28 = sshll.u32 %s137_s26, 6 }
  0x10   : > { %s831_s24 = scalar_select %p684_p11, 1, 0 }
  0x11   : > { %s832_s25 = scalar_select %p688_p12, 1, 0 }
  0x12   : > { %s697_s4 = scalar_lea.hbm %s824_s0, %s440_s27  ;;  %s141_s5 = scalar_lea.vmem [#allocation2], %s425_s28 }
  0x13   : > { %s148_s6 = sshll.u32 %s141_s5, 4  ;;  %p701_p13 = pnand %p466_p10, %p673_p5  ;;  %s705_s6 = int_to_ptr.vmem [resolvable:$true] %s148_s6 }
  0x14   : > { %s707_s8 = scalar_lea.sflag [#allocation3], %s137_s26  ;;  %s508_s9 = scalar_lea.hbm %s697_s4, 1024 }
  0x15   : > { %p509_p0 = scmp.ne.s32.totalorder %s697_s4, %s508_s9  ;;  %p510_p1 = pneg %p701_p13 }
  0x16   : > { %s513_s17 = scalar_lea.hbm %s824_s0, 2048  ;;  %p514_p4 = scmp.lt.u32.totalorder %s697_s4, %s824_s0 }
  0x17   : > { %p511_p2 = pnand %p510_p1, %p509_p0  ;;  %p515_p5 = scmp.lt.u32.totalorder %s513_s17, %s508_s9 }
  0x18   : > { %p517_p8 = scmp.lt.u32.totalorder %s508_s9, %s697_s4 }
  0x19   : > { %p512_p3 = pneg %p511_p2  ;;  %p516_p7 = por %p515_p5, %p514_p4 }
  0x1b   : > { %p518_p10 = por %p517_p8, %p516_p7 }
  0x1d   : > { %p519_p9 = pnand %p518_p10, %p512_p3 }
  0x1f   : > { %522 = shalt.err (!%p519_p9)
}
  0x20   : > { %s523_s22 = scalar_lea.vmem %s705_s6, 1024  ;;  %s606_s26 = smov [#allocation2]  }
  0x21   : > { %p524_p0 = scmp.ne.s32.totalorder %s705_s6, %s523_s22  ;;  %s528_s27 = sshll.u32 %s606_s26, 4  ;;  %s529_s27 = int_to_ptr.vmem [resolvable:$false] %s528_s27 }
  0x22   : > { %s530_s28 = scalar_lea.vmem %s529_s27, 2048  ;;  %p531_p11 = scmp.lt.s32.totalorder %s705_s6, %s529_s27 }
  0x23   : > { %p526_p2 = pnand %p524_p0, %p510_p1  ;;  %p532_p4 = scmp.lt.s32.totalorder %s530_s28, %s523_s22 }
  0x25   : > { %p527_p12 = pneg %p526_p2  ;;  %p533_p5 = por %p532_p4, %p531_p11 }
  0x27   : > { %p534_p7 = pnand %p533_p5, %p527_p12 }
  0x29   : > { %537 = shalt.err (!%p534_p7)
}
  0x2a   : > { %s607_s29 = smov 256   ;;  %s608_s30 = smov 16  }
  0x2b   : > { %461 = dma.hbm_to_vmem [thread:$0]  (!%p701_p13), %s697_s4, 1024, %s705_s6, %s707_s8, %s607_s29, %s607_s29, %s608_s30  }
  0x2c   : > { %p428_p9 = scmp.ge.s32.totalorder %s604_s15, 1  ;;  %p156_p1 = scmp.lt.s32.totalorder %s604_s15, 3 }
  0x2e   : > { %p157_p3 = pnand %p428_p9, %p156_p1 }
  0x2f   : > { %s738_s5 = sand.u32 (!%p157_p3), 1, %s596_s13  }
  0x30   : > { %160 = sbr.rel (%p157_p3) target bundleno = 301 (0x12d), region = 32  ;;  %s429_s9 = sshll.u32 (!%p157_p3), %s738_s5, 6 }
  0x31   : > { %s163_s10 = scalar_lea.sflag (!%p157_p3), [#allocation3], %s738_s5  ;;  %s166_s11 = scalar_lea.vmem (!%p157_p3), [#allocation2], %s429_s9 }
  0x37   : > { %583 = dma.done.wait (%p677_p6), %s163_s10, 1024  }
  0x38   : > { %585 = vsyncadd (%p677_p6), %s163_s10, 4294966272  ;;  %v609_v0 = vmov 0.0   ;;  %v610_v1 = vmov 0   ;;  %v194_v2 = vld [vmem:[%s166_s11 + $0x8] sm:$0xff]  ;;  %v196_v3 = vld [vmem:[%s166_s11 + $0x18] sm:$0xff]  ;;  %vm225_vm0 = vcmask 261120  }
  0x39   : > { %302 = vmatprep.mubr.f32.mxu0 %v609_v0  ;;  %314 = vmatprep.mubr.f32.mxu1 %v609_v0  ;;  %v193_v4 = vld [vmem:[%s166_s11] sm:$0xff]  ;;  %v442_v5 = vpack.c.bf16 %v196_v3, %v194_v2  ;;  %v195_v6 = vld [vmem:[%s166_s11 + $0x10] sm:$0xff]  ;;  %v198_v7 = vld [vmem:[%s166_s11 + $0x28] sm:$0xff]  ;;  %s188_s23 = scalar_lea.vmem [#allocation5], %s429_s9  ;;  %s441_s6 = sshll.u32 %s655_s16, 10 }
  0x3a   : > { %507 = vset.pattern.permute.xlu1 %v610_v1  ;;  %506 = vset.pattern.permute.xlu0 %v610_v1  ;;  %v200_v8 = vld [vmem:[%s166_s11 + $0x38] sm:$0xff]  ;;  %v444_v9 = vpack.c.bf16 %v195_v6, %v193_v4  ;;  %v197_v11 = vld [vmem:[%s166_s11 + $0x20] sm:$0xff]  ;;  %v199_v12 = vld [vmem:[%s166_s11 + $0x30] sm:$0xff]  ;;  %s349_s4 = sshll.u32 %s188_s23, 4  ;;  %s780_s7 = scalar_lea.hbm %s827_s3, %s441_s6  ;;  %s775_s4 = int_to_ptr.vmem [resolvable:$true] %s349_s4 }
  0x3b   : > { %v446_v10 = vpack.c.bf16 %v200_v8, %v198_v7  ;;  %443 = vmatprep.subr.bf16.mxu0 %v442_v5  ;;  %450 = vmatprep.subr.bf16.mxu1 %v442_v5  ;;  %v448_v13 = vpack.c.bf16 %v199_v12, %v197_v11  ;;  %v203_v14 = vld [vmem:[%s826_s2 + $0x10] sm:$0xff]  ;;  %v201_v15 = vld [vmem:[%s826_s2] sm:$0xff]  ;;  %v204_v16 = vld [vmem:[%s826_s2 + $0x18] sm:$0xff]  ;;  %s336_s8 = scalar_lea.sflag [#allocation4], %s738_s5  ;;  %s538_s17 = scalar_lea.vmem %s775_s4, 1024 }
  0x3c   : > { %445 = vmatpush1.bf16.msra.mxu0 %v444_v9  ;;  %452 = vmatpush1.bf16.msra.mxu1 %v444_v9  ;;  %v202_v17 = vld [vmem:[%s826_s2 + $0x8] sm:$0xff]  ;;  %v189_v18 = vld [vmem:[%s825_s1] sm:$0xff]  ;;  %v191_v19 = vld [vmem:[%s825_s1 + $0x10] sm:$0xff]  ;;  %p539_p6 = scmp.ne.s32.totalorder %s775_s4, %s538_s17  ;;  %p834_p11 = scmp.ne.s32.totalorder %s831_s24, 0 }
  0x3d   : > { %447 = vmatprep.subr.bf16.mxu0 %v446_v10  ;;  %451 = vmatprep.subr.bf16.mxu1 %v446_v10  ;;  %v190_v20 = vld [vmem:[%s825_s1 + $0x8] sm:$0xff]  ;;  %v192_v21 = vld [vmem:[%s825_s1 + $0x18] sm:$0xff]  ;;  %s611_s19 = smov [#allocation5]  }
  0x3e   : > { %217 = vperm.xlu1 %507, %v203_v14   ;;  %207 = vperm.xlu0 %506, %v201_v15   ;;  %p540_p12 = pnand %p539_p6, %p834_p11  ;;  %s542_s20 = sshll.u32 %s611_s19, 4  ;;  %s543_s20 = int_to_ptr.vmem [resolvable:$false] %s542_s20 }
  0x3f   : > { %s544_s22 = scalar_lea.vmem %s543_s20, 2048  ;;  %p545_p8 = scmp.lt.s32.totalorder %s775_s4, %s543_s20 }
  0x40   : > { %449 = vmatpush1.bf16.msra.mxu0 %v448_v13  ;;  %453 = vmatpush1.bf16.msra.mxu1 %v448_v13  ;;  %p541_p13 = pneg %p540_p12  ;;  %p546_p10 = scmp.lt.s32.totalorder %s544_s22, %s538_s17 }
  0x42   : > { %222 = vperm.xlu1 %507, %v204_v16   ;;  %212 = vperm.xlu0 %506, %v202_v17   ;;  %p547_p0 = por %p546_p10, %p545_p8 }
  0x43   : > { %431 = vmatmul.mubr.msk.f32.vlgmr.msra.gmra.mrb[0].mxu0 %vm225_vm0, %v189_v18  ;;  %433 = vmatmul.mubr.msk.f32.vlgmr.msra.gmra.mrb[0].mxu1 %vm225_vm0, %v191_v19 }
  0x44   : > { %308 = vmatprep.mubr.f32.mxu0 %v609_v0  ;;  %320 = vmatprep.mubr.f32.mxu1 %v609_v0  ;;  %p548_p2 = pnand %p547_p0, %p541_p13 }
  0x47   : > { %432 = vmatmul.mubr.msk.f32.gmra.mrb[2].mxu0 %vm225_vm0, %v190_v20  ;;  %434 = vmatmul.mubr.msk.f32.gmra.mrb[2].mxu1 %vm225_vm0, %v192_v21 }
  0xbd   : > { %v218_v22 = vpop.permute.xlu1 %217  ;;  %v208_v23 = vpop.permute.xlu0 %207 }
  0xc1   : > { %v223_v32 = vpop.permute.xlu1 %222  ;;  %v213_v33 = vpop.permute.xlu0 %212 }
 0x116   : > { %v304_v24 = vpop.f32.mrb[0].mxu0  ;;  %v316_v25 = vpop.f32.mrb[0].mxu1 }
 0x117   : > { %v305_v26 = vadd.f32 %v304_v24, %v208_v23  ;;  %v317_v27 = vadd.f32 %v316_v25, %v218_v22  ;;  %v306_v28 = vpop.f32.mrb[1].mxu0  ;;  %v318_v29 = vpop.f32.mrb[1].mxu1 }
 0x118   : > { %v307_v30 = vadd.f32 %v306_v28, %v208_v23  ;;  %v319_v31 = vadd.f32 %v318_v29, %v218_v22 }
 0x119   : > { %327 = vst [vmem:[%s188_s23] sm:$0xff] %v305_v26  ;;  %331 = vst [vmem:[%s188_s23 + $0x20] sm:$0xff] %v317_v27 }
 0x11a   : > { %328 = vst [vmem:[%s188_s23 + $0x8] sm:$0xff] %v307_v30  ;;  %332 = vst [vmem:[%s188_s23 + $0x28] sm:$0xff] %v319_v31  ;;  %v310_v34 = vpop.f32.mrb[2].mxu0  ;;  %v322_v35 = vpop.f32.mrb[2].mxu1 }
 0x11b   : > { %v311_v36 = vadd.f32 %v310_v34, %v213_v33  ;;  %v323_v37 = vadd.f32 %v322_v35, %v223_v32  ;;  %v312_v38 = vpop.f32.mrb[3].mxu0  ;;  %v324_v39 = vpop.f32.mrb[3].mxu1 }
 0x11c   : > { %v313_v40 = vadd.f32 %v312_v38, %v213_v33  ;;  %v325_v41 = vadd.f32 %v324_v39, %v223_v32 }
 0x11d   : > { %329 = vst [vmem:[%s188_s23 + $0x10] sm:$0xff] %v311_v36  ;;  %333 = vst [vmem:[%s188_s23 + $0x30] sm:$0xff] %v323_v37 }
 0x11e   : > { %330 = vst [vmem:[%s188_s23 + $0x18] sm:$0xff] %v313_v40  ;;  %334 = vst [vmem:[%s188_s23 + $0x38] sm:$0xff] %v325_v41 }
 0x11f   : > { %551 = shalt.err (!%p548_p2)
}
 0x120   : > { %s552_s26 = scalar_lea.hbm %s780_s7, 1024  ;;  %s556_s29 = scalar_lea.hbm %s827_s3, 2048 }
 0x121   : > { %p553_p4 = scmp.ne.s32.totalorder %s780_s7, %s552_s26  ;;  %p557_p9 = scmp.lt.u32.totalorder %s780_s7, %s827_s3 }
 0x122   : > { %p558_p1 = scmp.lt.u32.totalorder %s556_s29, %s552_s26  ;;  %p560_p6 = scmp.lt.u32.totalorder %s552_s26, %s780_s7 }
 0x123   : > { %p554_p5 = pnand %p553_p4, %p834_p11 }
 0x124   : > { %p559_p3 = por %p558_p1, %p557_p9 }
 0x125   : > { %p555_p7 = pneg %p554_p5 }
 0x126   : > { %p561_p12 = por %p560_p6, %p559_p3 }
 0x128   : > { %p562_p13 = pnand %p561_p12, %p555_p7 }
 0x12a   : > { %565 = shalt.err (!%p562_p13)
}
 0x12b   : > { %s612_s11 = smov 256   ;;  %s613_s23 = smov 16  }
 0x12c   : > { %456 = dma.vmem_to_hbm [thread:$0]  (%p834_p11), %s775_s4, 1024, %s780_s7, %s336_s8, %s612_s11, %s612_s11, %s613_s23  }
 0x12d PF: > { %s364_s6 = sand.u32 1, %s592_s12   ;;  %p835_p8 = scmp.ne.s32.totalorder %s832_s25, 0 }
 0x12e   : > { %p836_p10 = scmp.ge.s32.totalorder %s604_s15, 2  ;;  %s365_s9 = scalar_lea.sflag [#allocation4], %s364_s6 }
 0x130   : > { %p463_p0 = pnand %p836_p10, %p835_p8 }
 0x132   : > { %587 = dma.done.wait (!%p463_p0), %s365_s9, 1024  }
 0x133   : > { %589 = vsyncadd (!%p463_p0), %s365_s9, 4294966272  ;;  %p16_p2 = scmp.ge.s32.totalorder %s659_s18, 4   ;;  %s837_s12 = smov %s596_s13 }
 0x134   : > { %s838_s13 = smov %s600_s14  ;;  %s839_s14 = smov %s671_s21 }
 0x135   : > { %s840_s15 = smov %s659_s18  ;;  %18 = sbr.rel (!%p16_p2) target bundleno = 5 (0x5), region = 77 }
 0x13c   :  { %370 = vsyncpa [#allocation3], 1 }
 0x13d   :  { %372 = vsyncpa [#allocation3 + $0x1], 1 }
 0x13e   :  { %373 = vsyncpa [#allocation4], 1 }
 0x13f   :  { %375 = vsyncpa [#allocation4 + $0x1], 1 }

</bundles_post_ra>
